<compile_context>
chip_gen: v5e
topology: v5e:2x2
jax: 0.10.0
libtpu: 0.0.40
codegen_flags: <defaults>
</compile_context>

<pallas_src>
import jax
import jax.numpy as jnp
from jax.experimental import pallas as pl
from jax.experimental.pallas import tpu as pltpu

EPS = 1e-5  # nn.BatchNorm default eps


# ----------------------------------------------------------------------------
# Single fused Pallas kernel: Conv1x1 + BN1d(eval, folded) + ReLU + Linear
# ----------------------------------------------------------------------------
def _policy_head_kernel(x_ref, w1_ref, scale_ref, shift_ref, w2_ref, b2_ref,
                        o_ref):
    """All tensor operands are whole-array VMEM blocks; w1 is SMEM scalars.

    x:     (B, F, P)    input with spatial flattened (P = H*W) on the lane axis
    w1:    (2, F)       1x1-conv weight (SMEM; read as scalars)
    scale: (2, P)       folded eval-mode BN scale, indexed [c, p] == flat c*P+p
    shift: (2, P)       folded conv-bias + BN shift
    w2:    (2, P, 225)  Linear weight rows pre-reordered to [c, p, :]
    b2:    (1, 225)     Linear bias
    o:     (B, 225)
    """
    x = x_ref[...]                       # (B, F, P), vreg-resident
    scale = scale_ref[...]               # (2, P)
    shift = shift_ref[...]               # (2, P)
    n_feat = x_ref.shape[1]

    acc = None
    for c in range(2):                   # static: 2 conv output channels
        # 1x1 conv on the VPU: hc[b, p] = sum_f w1[c, f] * x[b, f, p].
        # F is tiny, so F scalar*vector FMAs per channel beat a 2-row MXU call.
        hc = w1_ref[c, 0] * x[:, 0, :]                       # (B, P)
        for f in range(1, n_feat):
            hc = hc + w1_ref[c, f] * x[:, f, :]
        # Folded (conv bias + BatchNorm1d eval) affine, then ReLU — lane-dense.
        hc = jnp.maximum(hc * scale[c:c + 1, :] + shift[c:c + 1, :], 0.0)
        # Linear(2*P, 225) as two lane-dense (B, P) @ (P, 225) matmuls; this
        # honours the NCHW flatten order and avoids reshaping (B, 2, P) ->
        # (B, 2P), which would force a lane relayout (P = 225 not lane-aligned).
        part = jnp.dot(hc, w2_ref[c], preferred_element_type=jnp.float32)
        acc = part if acc is None else acc + part            # (B, 225)

    o_ref[...] = (acc + b2_ref[...]).astype(o_ref.dtype)     # one full-block store


def policy_network_forward(x_nchw, fp):
    b, f, h, w = x_nchw.shape
    p = h * w
    x = x_nchw.reshape(b, f, p)  # free reshape (NCHW is contiguous)
    n_out = fp["w2"].shape[2]
    return pl.pallas_call(
        _policy_head_kernel,
        out_shape=jax.ShapeDtypeStruct((b, n_out), jnp.float32),
        in_specs=[
            pl.BlockSpec(memory_space=pltpu.MemorySpace.VMEM),   # x
            pl.BlockSpec(memory_space=pltpu.MemorySpace.SMEM),   # w1 (scalars)
            pl.BlockSpec(memory_space=pltpu.MemorySpace.VMEM),   # scale
            pl.BlockSpec(memory_space=pltpu.MemorySpace.VMEM),   # shift
            pl.BlockSpec(memory_space=pltpu.MemorySpace.VMEM),   # w2
            pl.BlockSpec(memory_space=pltpu.MemorySpace.VMEM),   # b2
        ],
        out_specs=pl.BlockSpec(memory_space=pltpu.MemorySpace.VMEM),
    )(x, fp["w1t"], fp["scale"], fp["shift"], fp["w2"], fp["b2"])


# ----------------------------------------------------------------------------
# Deterministic synthetic parameters (PyTorch layout), folding, JAX reference
# ----------------------------------------------------------------------------
def init_raw_params(key, filters, h, w):
    n_feat = 2 * h * w   # 450 for 15x15 boards (matches nn.BatchNorm1d(450))
    n_out = 225
    keys = iter(jax.random.split(key, 16))
    nxt = lambda: next(keys)

    bound1 = float(1.0 / (filters * 1 * 1) ** 0.5)
    raw = dict(
        w1=jax.random.uniform(nxt(), (2, filters, 1, 1), jnp.float32,
                              -bound1, bound1),                  # torch (Cout,Cin,1,1)
        b1=jax.random.uniform(nxt(), (2,), jnp.float32, -bound1, bound1),
        gamma=jax.random.uniform(nxt(), (n_feat,), jnp.float32, 0.5, 1.5),
        beta=0.1 * jax.random.normal(nxt(), (n_feat,), jnp.float32),
        mean=0.1 * jax.random.normal(nxt(), (n_feat,), jnp.float32),
        var=jax.random.uniform(nxt(), (n_feat,), jnp.float32, 0.5, 1.5),
    )
    bound2 = float(1.0 / n_feat ** 0.5)
    raw["w2"] = jax.random.uniform(nxt(), (n_out, n_feat), jnp.float32,
                                   -bound2, bound2)              # torch (out, in)
    raw["b2"] = jax.random.uniform(nxt(), (n_out,), jnp.float32, -bound2, bound2)
    return raw


def fold_params(raw, h, w):
    """Fold conv bias + eval-mode BN1d into per-feature (scale, shift), reorder
    everything into the lane-dense kernel layout (all done once, offline)."""
    p = h * w
    s = raw["gamma"] / jnp.sqrt(raw["var"] + EPS)                         # (2P,)
    shift = (jnp.repeat(raw["b1"], p) - raw["mean"]) * s + raw["beta"]    # (2P,)
    return dict(
        w1t=raw["w1"].reshape(2, -1),          # (2, F)   -> SMEM scalars
        scale=s.reshape(2, p),                 # (2, P)   index [c, p] = c*P + p
        shift=shift.reshape(2, p),             # (2, P)
        w2=raw["w2"].T.reshape(2, p, -1),      # (2, P, 225), rows in c*P+p order
        b2=raw["b2"][None, :],                 # (1, 225)
    )


def reference(x_nchw, raw):
    """Pure-JAX reference with original (un-folded) PyTorch-layout params."""
    y = jax.lax.conv_general_dilated(
        x_nchw, raw["w1"], window_strides=(1, 1), padding="VALID",
        dimension_numbers=("NCHW", "OIHW", "NCHW"))
    y = y + raw["b1"][None, :, None, None]
    y = y.reshape(y.shape[0], -1)                                  # Flatten (NCHW)
    s = raw["gamma"] / jnp.sqrt(raw["var"] + EPS)
    y = (y - raw["mean"]) * s + raw["beta"]                        # BatchNorm1d (eval)
    y = jnp.maximum(y, 0.0)                                        # ReLU
    return y @ raw["w2"].T + raw["b2"]                             # Linear(450, 225)


if __name__ == "__main__":
    FILTERS = 8
    BATCH = 2
    H = W = 15  # 1x1 conv -> 2 channels; Flatten gives 2*15*15 = 450 = BatchNorm1d(450)

    key = jax.random.PRNGKey(0)
    kx, kp = jax.random.split(key)
    x = jax.random.normal(kx, (BATCH, FILTERS, H, W), jnp.float32)  # NCHW like PyTorch

    raw = init_raw_params(kp, FILTERS, H, W)
    fp = fold_params(raw, H, W)

    out = jax.jit(policy_network_forward)(x, fp)
    out = jax.block_until_ready(out)

    ref = reference(x, raw)
    assert out.shape == (BATCH, 225), out.shape
    assert jnp.allclose(out, ref, atol=1e-4, rtol=1e-4), (
        float(jnp.max(jnp.abs(out - ref))))

    print("KERNEL_OK")
</pallas_src>

<mosaic_0001>
module attributes {stable_mosaic.version = 11 : i64} {
  func.func @_policy_head_kernel(%arg0: memref<2x8x225xf32, #tpu.memory_space<vmem>>, %arg1: memref<2x8xf32, #tpu.memory_space<smem>>, %arg2: memref<2x225xf32, #tpu.memory_space<vmem>>, %arg3: memref<2x225xf32, #tpu.memory_space<vmem>>, %arg4: memref<2x225x225xf32, #tpu.memory_space<vmem>>, %arg5: memref<1x225xf32, #tpu.memory_space<vmem>>, %arg6: memref<2x225xf32, #tpu.memory_space<vmem>>) attributes {dimension_semantics = [], scalar_prefetch = 0 : i64, scratch_operands = 0 : i64, tpu.core_type = #tpu.core_type<tc>} {
    %c0 = arith.constant 0 : index
    %c0_0 = arith.constant 0 : index
    %c0_1 = arith.constant 0 : index
    %0 = vector.load %arg0[%c0, %c0_0, %c0_1] : memref<2x8x225xf32, #tpu.memory_space<vmem>>, vector<2x8x225xf32>
    %c0_2 = arith.constant 0 : index
    %c0_3 = arith.constant 0 : index
    %1 = vector.load %arg2[%c0_2, %c0_3] : memref<2x225xf32, #tpu.memory_space<vmem>>, vector<2x225xf32>
    %c0_4 = arith.constant 0 : index
    %c0_5 = arith.constant 0 : index
    %2 = vector.load %arg3[%c0_4, %c0_5] : memref<2x225xf32, #tpu.memory_space<vmem>>, vector<2x225xf32>
    %c0_6 = arith.constant 0 : index
    %c0_7 = arith.constant 0 : index
    %3 = memref.load %arg1[%c0_6, %c0_7] : memref<2x8xf32, #tpu.memory_space<smem>>
    %4 = vector.extract_strided_slice %0 {offsets = [0, 0, 0], sizes = [2, 1, 225], strides = [1, 1, 1]} : vector<2x8x225xf32> to vector<2x1x225xf32>
    %5 = vector.shape_cast %4 : vector<2x1x225xf32> to vector<2x225xf32>
    %6 = vector.broadcast %3 : f32 to vector<2x225xf32>
    %7 = arith.mulf %6, %5 : vector<2x225xf32>
    %c0_8 = arith.constant 0 : index
    %c1 = arith.constant 1 : index
    %8 = memref.load %arg1[%c0_8, %c1] : memref<2x8xf32, #tpu.memory_space<smem>>
    %9 = vector.extract_strided_slice %0 {offsets = [0, 1, 0], sizes = [2, 1, 225], strides = [1, 1, 1]} : vector<2x8x225xf32> to vector<2x1x225xf32>
    %10 = vector.shape_cast %9 : vector<2x1x225xf32> to vector<2x225xf32>
    %11 = vector.broadcast %8 : f32 to vector<2x225xf32>
    %12 = arith.mulf %11, %10 : vector<2x225xf32>
    %13 = arith.addf %7, %12 : vector<2x225xf32>
    %c0_9 = arith.constant 0 : index
    %c2 = arith.constant 2 : index
    %14 = memref.load %arg1[%c0_9, %c2] : memref<2x8xf32, #tpu.memory_space<smem>>
    %15 = vector.extract_strided_slice %0 {offsets = [0, 2, 0], sizes = [2, 1, 225], strides = [1, 1, 1]} : vector<2x8x225xf32> to vector<2x1x225xf32>
    %16 = vector.shape_cast %15 : vector<2x1x225xf32> to vector<2x225xf32>
    %17 = vector.broadcast %14 : f32 to vector<2x225xf32>
    %18 = arith.mulf %17, %16 : vector<2x225xf32>
    %19 = arith.addf %13, %18 : vector<2x225xf32>
    %c0_10 = arith.constant 0 : index
    %c3 = arith.constant 3 : index
    %20 = memref.load %arg1[%c0_10, %c3] : memref<2x8xf32, #tpu.memory_space<smem>>
    %21 = vector.extract_strided_slice %0 {offsets = [0, 3, 0], sizes = [2, 1, 225], strides = [1, 1, 1]} : vector<2x8x225xf32> to vector<2x1x225xf32>
    %22 = vector.shape_cast %21 : vector<2x1x225xf32> to vector<2x225xf32>
    %23 = vector.broadcast %20 : f32 to vector<2x225xf32>
    %24 = arith.mulf %23, %22 : vector<2x225xf32>
    %25 = arith.addf %19, %24 : vector<2x225xf32>
    %c0_11 = arith.constant 0 : index
    %c4 = arith.constant 4 : index
    %26 = memref.load %arg1[%c0_11, %c4] : memref<2x8xf32, #tpu.memory_space<smem>>
    %27 = vector.extract_strided_slice %0 {offsets = [0, 4, 0], sizes = [2, 1, 225], strides = [1, 1, 1]} : vector<2x8x225xf32> to vector<2x1x225xf32>
    %28 = vector.shape_cast %27 : vector<2x1x225xf32> to vector<2x225xf32>
    %29 = vector.broadcast %26 : f32 to vector<2x225xf32>
    %30 = arith.mulf %29, %28 : vector<2x225xf32>
    %31 = arith.addf %25, %30 : vector<2x225xf32>
    %c0_12 = arith.constant 0 : index
    %c5 = arith.constant 5 : index
    %32 = memref.load %arg1[%c0_12, %c5] : memref<2x8xf32, #tpu.memory_space<smem>>
    %33 = vector.extract_strided_slice %0 {offsets = [0, 5, 0], sizes = [2, 1, 225], strides = [1, 1, 1]} : vector<2x8x225xf32> to vector<2x1x225xf32>
    %34 = vector.shape_cast %33 : vector<2x1x225xf32> to vector<2x225xf32>
    %35 = vector.broadcast %32 : f32 to vector<2x225xf32>
    %36 = arith.mulf %35, %34 : vector<2x225xf32>
    %37 = arith.addf %31, %36 : vector<2x225xf32>
    %c0_13 = arith.constant 0 : index
    %c6 = arith.constant 6 : index
    %38 = memref.load %arg1[%c0_13, %c6] : memref<2x8xf32, #tpu.memory_space<smem>>
    %39 = vector.extract_strided_slice %0 {offsets = [0, 6, 0], sizes = [2, 1, 225], strides = [1, 1, 1]} : vector<2x8x225xf32> to vector<2x1x225xf32>
    %40 = vector.shape_cast %39 : vector<2x1x225xf32> to vector<2x225xf32>
    %41 = vector.broadcast %38 : f32 to vector<2x225xf32>
    %42 = arith.mulf %41, %40 : vector<2x225xf32>
    %43 = arith.addf %37, %42 : vector<2x225xf32>
    %c0_14 = arith.constant 0 : index
    %c7 = arith.constant 7 : index
    %44 = memref.load %arg1[%c0_14, %c7] : memref<2x8xf32, #tpu.memory_space<smem>>
    %45 = vector.extract_strided_slice %0 {offsets = [0, 7, 0], sizes = [2, 1, 225], strides = [1, 1, 1]} : vector<2x8x225xf32> to vector<2x1x225xf32>
    %46 = vector.shape_cast %45 : vector<2x1x225xf32> to vector<2x225xf32>
    %47 = vector.broadcast %44 : f32 to vector<2x225xf32>
    %48 = arith.mulf %47, %46 : vector<2x225xf32>
    %49 = arith.addf %43, %48 : vector<2x225xf32>
    %50 = vector.extract_strided_slice %1 {offsets = [0, 0], sizes = [1, 225], strides = [1, 1]} : vector<2x225xf32> to vector<1x225xf32>
    %51 = vector.broadcast %50 : vector<1x225xf32> to vector<2x225xf32>
    %52 = arith.mulf %49, %51 : vector<2x225xf32>
    %53 = vector.extract_strided_slice %2 {offsets = [0, 0], sizes = [1, 225], strides = [1, 1]} : vector<2x225xf32> to vector<1x225xf32>
    %54 = vector.broadcast %53 : vector<1x225xf32> to vector<2x225xf32>
    %55 = arith.addf %52, %54 : vector<2x225xf32>
    %cst = arith.constant 0.000000e+00 : f32
    %56 = vector.broadcast %cst : f32 to vector<2x225xf32>
    %57 = arith.maximumf %55, %56 : vector<2x225xf32>
    %c0_15 = arith.constant 0 : index
    %c0_16 = arith.constant 0 : index
    %c0_17 = arith.constant 0 : index
    %58 = vector.load %arg4[%c0_15, %c0_16, %c0_17] : memref<2x225x225xf32, #tpu.memory_space<vmem>>, vector<1x225x225xf32>
    %59 = vector.shape_cast %58 : vector<1x225x225xf32> to vector<225x225xf32>
    %cst_18 = arith.constant dense<0.000000e+00> : vector<2x225xf32>
    %60 = tpu.matmul %57, %59, %cst_18 {dimension_numbers = #tpu.dot_dimension_numbers<[1], [0], [0], [1], [0, 0, 1, 1], [], []>} : vector<2x225xf32>, vector<225x225xf32>, vector<2x225xf32> -> vector<2x225xf32>
    %c1_19 = arith.constant 1 : index
    %c0_20 = arith.constant 0 : index
    %61 = memref.load %arg1[%c1_19, %c0_20] : memref<2x8xf32, #tpu.memory_space<smem>>
    %62 = vector.extract_strided_slice %0 {offsets = [0, 0, 0], sizes = [2, 1, 225], strides = [1, 1, 1]} : vector<2x8x225xf32> to vector<2x1x225xf32>
    %63 = vector.shape_cast %62 : vector<2x1x225xf32> to vector<2x225xf32>
    %64 = vector.broadcast %61 : f32 to vector<2x225xf32>
    %65 = arith.mulf %64, %63 : vector<2x225xf32>
    %c1_21 = arith.constant 1 : index
    %c1_22 = arith.constant 1 : index
    %66 = memref.load %arg1[%c1_21, %c1_22] : memref<2x8xf32, #tpu.memory_space<smem>>
    %67 = vector.extract_strided_slice %0 {offsets = [0, 1, 0], sizes = [2, 1, 225], strides = [1, 1, 1]} : vector<2x8x225xf32> to vector<2x1x225xf32>
    %68 = vector.shape_cast %67 : vector<2x1x225xf32> to vector<2x225xf32>
    %69 = vector.broadcast %66 : f32 to vector<2x225xf32>
    %70 = arith.mulf %69, %68 : vector<2x225xf32>
    %71 = arith.addf %65, %70 : vector<2x225xf32>
    %c1_23 = arith.constant 1 : index
    %c2_24 = arith.constant 2 : index
    %72 = memref.load %arg1[%c1_23, %c2_24] : memref<2x8xf32, #tpu.memory_space<smem>>
    %73 = vector.extract_strided_slice %0 {offsets = [0, 2, 0], sizes = [2, 1, 225], strides = [1, 1, 1]} : vector<2x8x225xf32> to vector<2x1x225xf32>
    %74 = vector.shape_cast %73 : vector<2x1x225xf32> to vector<2x225xf32>
    %75 = vector.broadcast %72 : f32 to vector<2x225xf32>
    %76 = arith.mulf %75, %74 : vector<2x225xf32>
    %77 = arith.addf %71, %76 : vector<2x225xf32>
    %c1_25 = arith.constant 1 : index
    %c3_26 = arith.constant 3 : index
    %78 = memref.load %arg1[%c1_25, %c3_26] : memref<2x8xf32, #tpu.memory_space<smem>>
    %79 = vector.extract_strided_slice %0 {offsets = [0, 3, 0], sizes = [2, 1, 225], strides = [1, 1, 1]} : vector<2x8x225xf32> to vector<2x1x225xf32>
    %80 = vector.shape_cast %79 : vector<2x1x225xf32> to vector<2x225xf32>
    %81 = vector.broadcast %78 : f32 to vector<2x225xf32>
    %82 = arith.mulf %81, %80 : vector<2x225xf32>
    %83 = arith.addf %77, %82 : vector<2x225xf32>
    %c1_27 = arith.constant 1 : index
    %c4_28 = arith.constant 4 : index
    %84 = memref.load %arg1[%c1_27, %c4_28] : memref<2x8xf32, #tpu.memory_space<smem>>
    %85 = vector.extract_strided_slice %0 {offsets = [0, 4, 0], sizes = [2, 1, 225], strides = [1, 1, 1]} : vector<2x8x225xf32> to vector<2x1x225xf32>
    %86 = vector.shape_cast %85 : vector<2x1x225xf32> to vector<2x225xf32>
    %87 = vector.broadcast %84 : f32 to vector<2x225xf32>
    %88 = arith.mulf %87, %86 : vector<2x225xf32>
    %89 = arith.addf %83, %88 : vector<2x225xf32>
    %c1_29 = arith.constant 1 : index
    %c5_30 = arith.constant 5 : index
    %90 = memref.load %arg1[%c1_29, %c5_30] : memref<2x8xf32, #tpu.memory_space<smem>>
    %91 = vector.extract_strided_slice %0 {offsets = [0, 5, 0], sizes = [2, 1, 225], strides = [1, 1, 1]} : vector<2x8x225xf32> to vector<2x1x225xf32>
    %92 = vector.shape_cast %91 : vector<2x1x225xf32> to vector<2x225xf32>
    %93 = vector.broadcast %90 : f32 to vector<2x225xf32>
    %94 = arith.mulf %93, %92 : vector<2x225xf32>
    %95 = arith.addf %89, %94 : vector<2x225xf32>
    %c1_31 = arith.constant 1 : index
    %c6_32 = arith.constant 6 : index
    %96 = memref.load %arg1[%c1_31, %c6_32] : memref<2x8xf32, #tpu.memory_space<smem>>
    %97 = vector.extract_strided_slice %0 {offsets = [0, 6, 0], sizes = [2, 1, 225], strides = [1, 1, 1]} : vector<2x8x225xf32> to vector<2x1x225xf32>
    %98 = vector.shape_cast %97 : vector<2x1x225xf32> to vector<2x225xf32>
    %99 = vector.broadcast %96 : f32 to vector<2x225xf32>
    %100 = arith.mulf %99, %98 : vector<2x225xf32>
    %101 = arith.addf %95, %100 : vector<2x225xf32>
    %c1_33 = arith.constant 1 : index
    %c7_34 = arith.constant 7 : index
    %102 = memref.load %arg1[%c1_33, %c7_34] : memref<2x8xf32, #tpu.memory_space<smem>>
    %103 = vector.extract_strided_slice %0 {offsets = [0, 7, 0], sizes = [2, 1, 225], strides = [1, 1, 1]} : vector<2x8x225xf32> to vector<2x1x225xf32>
    %104 = vector.shape_cast %103 : vector<2x1x225xf32> to vector<2x225xf32>
    %105 = vector.broadcast %102 : f32 to vector<2x225xf32>
    %106 = arith.mulf %105, %104 : vector<2x225xf32>
    %107 = arith.addf %101, %106 : vector<2x225xf32>
    %108 = vector.extract_strided_slice %1 {offsets = [1, 0], sizes = [1, 225], strides = [1, 1]} : vector<2x225xf32> to vector<1x225xf32>
    %109 = vector.broadcast %108 : vector<1x225xf32> to vector<2x225xf32>
    %110 = arith.mulf %107, %109 : vector<2x225xf32>
    %111 = vector.extract_strided_slice %2 {offsets = [1, 0], sizes = [1, 225], strides = [1, 1]} : vector<2x225xf32> to vector<1x225xf32>
    %112 = vector.broadcast %111 : vector<1x225xf32> to vector<2x225xf32>
    %113 = arith.addf %110, %112 : vector<2x225xf32>
    %cst_35 = arith.constant 0.000000e+00 : f32
    %114 = vector.broadcast %cst_35 : f32 to vector<2x225xf32>
    %115 = arith.maximumf %113, %114 : vector<2x225xf32>
    %c1_36 = arith.constant 1 : index
    %c0_37 = arith.constant 0 : index
    %c0_38 = arith.constant 0 : index
    %116 = vector.load %arg4[%c1_36, %c0_37, %c0_38] : memref<2x225x225xf32, #tpu.memory_space<vmem>>, vector<1x225x225xf32>
    %117 = vector.shape_cast %116 : vector<1x225x225xf32> to vector<225x225xf32>
    %cst_39 = arith.constant dense<0.000000e+00> : vector<2x225xf32>
    %118 = tpu.matmul %115, %117, %cst_39 {dimension_numbers = #tpu.dot_dimension_numbers<[1], [0], [0], [1], [0, 0, 1, 1], [], []>} : vector<2x225xf32>, vector<225x225xf32>, vector<2x225xf32> -> vector<2x225xf32>
    %119 = arith.addf %60, %118 : vector<2x225xf32>
    %c0_40 = arith.constant 0 : index
    %c0_41 = arith.constant 0 : index
    %120 = vector.load %arg5[%c0_40, %c0_41] : memref<1x225xf32, #tpu.memory_space<vmem>>, vector<1x225xf32>
    %121 = vector.broadcast %120 : vector<1x225xf32> to vector<2x225xf32>
    %122 = arith.addf %119, %121 : vector<2x225xf32>
    %c0_42 = arith.constant 0 : index
    %c0_43 = arith.constant 0 : index
    %123 = vector.load %arg6[%c0_42, %c0_43] : memref<2x225xf32, #tpu.memory_space<vmem>>, vector<2x225xf32>
    tpu.vector_store %arg6[%c0_42, %c0_43], %122 {strides = array<i32>} : memref<2x225xf32, #tpu.memory_space<vmem>>, vector<2x225xf32>,
    return
  }
}

</mosaic_0001>

<bundles_post_ra>
// kernel: policy_network_forward.1
= control target key start
LH: loop header
LB: loop body
LE: loop exit
PB: predicated region body
PF: predicated region fallthrough
CT: control target
= control target key end

     0   :  { %11 = vsyncpa [#allocation4], 0  ;;  %s1568_s0 = inlined_call_operand.vmem [shape: f32[2,8,225], index: 0, kind: input, shape index: {}]   ;;  %s1569_s1 = inlined_call_operand.vmem [shape: f32[2,8], index: 1, kind: input, shape index: {}]   ;;  %s1570_s2 = inlined_call_operand.vmem [shape: f32[2,225], index: 2, kind: input, shape index: {}]   ;;  %s1571_s3 = inlined_call_operand.vmem [shape: f32[2,225], index: 3, kind: input, shape index: {}]   ;;  %s1572_s4 = inlined_call_operand.vmem [shape: f32[2,225,225], index: 4, kind: input, shape index: {}]   ;;  %s1573_s5 = inlined_call_operand.vmem [shape: f32[1,225], index: 5, kind: input, shape index: {}]   ;;  %s1574_s6 = inlined_call_operand.hbm [shape: f32[2,225], index: 6, kind: output, shape index: {}]  }
   0x1   :  { %12 = vsyncpa [#allocation3], 0  ;;  %s20_s23 = sshll.u32 %s1569_s1, 4  ;;  %s884_s24 = smov [#allocation2]   ;;  %s21_s23 = int_to_ptr.vmem [resolvable:$true] %s20_s23 }
   0x2   :  { %23 = dma.vmem_to_smem %s21_s23, 32, %s884_s24, [#allocation4]  }
   0x3   :  { %880 = dma.done.wait [#allocation4], 32  }
   0x4   :  { %881 = vsyncadd [#allocation4], 4294967264 }
   0x5   :  { %36 = sfence }
   0x6   :  { %v806_v0 = vld [vmem:[%s1572_s4 + $0x2c0] sm:$0xff]  ;;  %v832_v1 = vld [vmem:[%s1572_s4 + $0x390] sm:$0x1]  ;;  %vm543_vm0 = vcmask 1040384   ;;  %v807_v4 = vld [vmem:[%s1572_s4 + $0x2c8] sm:$0xff]  ;;  %s1004_s27 = sld [smem:[#allocation2 + $0x80]] }
   0x7   :  { %v804_v2 = vld [vmem:[%s1572_s4 + $0x2b0] sm:$0xff]  ;;  %550 = vmatpush.msra.mxu0 %v806_v0  ;;  %834 = vmatpush.msk.msra.mxu1 %vm543_vm0, %v832_v1  ;;  %v830_v3 = vld [vmem:[%s1572_s4 + $0x380] sm:$0xff]  ;;  %v833_v5 = vld [vmem:[%s1572_s4 + $0x398] sm:$0x1]  ;;  %s1012_s7 = sld [smem:[#allocation2 + $0x81]]  ;;  %vm535_vm1 = vcmask 1041409  }
   0x8   :  { %590 = vmatpush.msra.mxu2 %v807_v4  ;;  %836 = vmatpush.msk.msra.mxu3 %vm543_vm0, %v833_v5  ;;  %v802_v6 = vld [vmem:[%s1572_s4 + $0x2a0] sm:$0xff]  ;;  %v828_v7 = vld [vmem:[%s1572_s4 + $0x370] sm:$0xff]  ;;  %v805_v8 = vld [vmem:[%s1572_s4 + $0x2b8] sm:$0xff]  ;;  %s1020_s12 = sld [smem:[#allocation2 + $0x82]]  ;;  %vm540_vm2 = vcmask 793600   ;;  %vm738_vm3 = vcmask 1041408  }
   0x9   :  { %551 = vmatpush.msra.mxu0 %v804_v2  ;;  %574 = vmatpush.msra.mxu1 %v830_v3  ;;  %v831_v9 = vld [vmem:[%s1572_s4 + $0x388] sm:$0xff]  ;;  %v800_v10 = vld [vmem:[%s1572_s4 + $0x290] sm:$0xff]  ;;  %v826_v11 = vld [vmem:[%s1572_s4 + $0x360] sm:$0xff]  ;;  %s1028_s17 = sld [smem:[#allocation2 + $0x83]]  ;;  %vm741_vm4 = vcmask 789506   ;;  %s885_s25 = smov [#allocation5]  }
   0xa   :  { %591 = vmatpush.msra.mxu2 %v805_v8  ;;  %614 = vmatpush.msra.mxu3 %v831_v9  ;;  %v803_v12 = vld [vmem:[%s1572_s4 + $0x2a8] sm:$0xff]  ;;  %v829_v13 = vld [vmem:[%s1572_s4 + $0x378] sm:$0xff]  ;;  %v798_v16 = vld [vmem:[%s1572_s4 + $0x280] sm:$0xff]  ;;  %s1036_s22 = sld [smem:[#allocation2 + $0x84]] }
   0xb   :  { %552 = vmatpush.msra.mxu0 %v802_v6  ;;  %575 = vmatpush.msra.mxu1 %v828_v7  ;;  %v801_v14 = vld [vmem:[%s1572_s4 + $0x298] sm:$0xff]  ;;  %v827_v15 = vld [vmem:[%s1572_s4 + $0x368] sm:$0xff]  ;;  %v824_v17 = vld [vmem:[%s1572_s4 + $0x350] sm:$0xff]  ;;  %s1044_s28 = sld [smem:[#allocation2 + $0x85]] }
   0xc   :  { %592 = vmatpush.msra.mxu2 %v803_v12  ;;  %615 = vmatpush.msra.mxu3 %v829_v13  ;;  %v799_v18 = vld [vmem:[%s1572_s4 + $0x288] sm:$0xff]  ;;  %v825_v19 = vld [vmem:[%s1572_s4 + $0x358] sm:$0xff]  ;;  %v796_v20 = vld [vmem:[%s1572_s4 + $0x270] sm:$0xff]  ;;  %s1052_s9 = sld [smem:[#allocation2 + $0x86]]  ;;  %v1109_v52 = vstv %s1004_s27 }
   0xd   :  { %553 = vmatpush.msra.mxu0 %v800_v10  ;;  %576 = vmatpush.msra.mxu1 %v826_v11  ;;  %v822_v21 = vld [vmem:[%s1572_s4 + $0x340] sm:$0xff]  ;;  %v797_v22 = vld [vmem:[%s1572_s4 + $0x278] sm:$0xff]  ;;  %v823_v23 = vld [vmem:[%s1572_s4 + $0x348] sm:$0xff]  ;;  %s1060_s15 = sld [smem:[#allocation2 + $0x87]]  ;;  %v1112_v53 = vstv %s1012_s7 }
   0xe   :  { %593 = vmatpush.msra.mxu2 %v801_v14  ;;  %616 = vmatpush.msra.mxu3 %v827_v15  ;;  %v794_v24 = vld [vmem:[%s1572_s4 + $0x260] sm:$0xff]  ;;  %v820_v25 = vld [vmem:[%s1572_s4 + $0x330] sm:$0xff]  ;;  %v795_v26 = vld [vmem:[%s1572_s4 + $0x268] sm:$0xff]  ;;  %s1068_s21 = sld [smem:[#allocation2]]  ;;  %v1121_v56 = vstv %s1020_s12 }
   0xf   :  { %554 = vmatpush.msra.mxu0 %v798_v16  ;;  %577 = vmatpush.msra.mxu1 %v824_v17  ;;  %v821_v27 = vld [vmem:[%s1572_s4 + $0x338] sm:$0xff]  ;;  %v792_v28 = vld [vmem:[%s1572_s4 + $0x250] sm:$0xff]  ;;  %v818_v29 = vld [vmem:[%s1572_s4 + $0x320] sm:$0xff]  ;;  %s1076_s29 = sld [smem:[#allocation2 + $0x1]]  ;;  %v1124_v57 = vstv %s1028_s17 }
  0x10   :  { %594 = vmatpush.msra.mxu2 %v799_v18  ;;  %617 = vmatpush.msra.mxu3 %v825_v19  ;;  %v793_v30 = vld [vmem:[%s1572_s4 + $0x258] sm:$0xff]  ;;  %v819_v31 = vld [vmem:[%s1572_s4 + $0x328] sm:$0xff]  ;;  %v790_v32 = vld [vmem:[%s1572_s4 + $0x240] sm:$0xff]  ;;  %s1084_s11 = sld [smem:[#allocation2 + $0x2]]  ;;  %v1133_v60 = vstv %s1036_s22 }
  0x11   :  { %555 = vmatpush.msra.mxu0 %v796_v20  ;;  %578 = vmatpush.msra.mxu1 %v822_v21  ;;  %v816_v33 = vld [vmem:[%s1572_s4 + $0x310] sm:$0xff]  ;;  %v791_v34 = vld [vmem:[%s1572_s4 + $0x248] sm:$0xff]  ;;  %v817_v35 = vld [vmem:[%s1572_s4 + $0x318] sm:$0xff]  ;;  %s1092_s19 = sld [smem:[#allocation2 + $0x3]]  ;;  %v1136_v61 = vstv %s1044_s28  ;;  %s751_s28 = sshll.u32 %s1574_s6, 4  ;;  %s752_s28 = int_to_ptr.hbm [resolvable:$true] %s751_s28 }
  0x12   :  { %595 = vmatpush.msra.mxu2 %v797_v22  ;;  %618 = vmatpush.msra.mxu3 %v823_v23  ;;  %v788_v36 = vld [vmem:[%s1572_s4 + $0x230] sm:$0xff]  ;;  %v814_v37 = vld [vmem:[%s1572_s4 + $0x300] sm:$0xff]  ;;  %v789_v38 = vld [vmem:[%s1572_s4 + $0x238] sm:$0xff]  ;;  %s1100_s26 = sld [smem:[#allocation2 + $0x4]]  ;;  %v1145_v0 = vstv %s1052_s9 }
  0x13   :  { %556 = vmatpush.msra.mxu0 %v794_v24  ;;  %579 = vmatpush.msra.mxu1 %v820_v25  ;;  %v815_v39 = vld [vmem:[%s1572_s4 + $0x308] sm:$0xff]  ;;  %v786_v40 = vld [vmem:[%s1572_s4 + $0x220] sm:$0xff]  ;;  %v812_v41 = vld [vmem:[%s1572_s4 + $0x2f0] sm:$0xff]  ;;  %v1148_v1 = vstv %s1060_s15  ;;  %s1451_s9 = sld [smem:[#allocation2 + $0x5]] }
  0x14   :  { %596 = vmatpush.msra.mxu2 %v795_v26  ;;  %619 = vmatpush.msra.mxu3 %v821_v27  ;;  %v787_v42 = vld [vmem:[%s1572_s4 + $0x228] sm:$0xff]  ;;  %v813_v43 = vld [vmem:[%s1572_s4 + $0x2f8] sm:$0xff]  ;;  %v784_v44 = vld [vmem:[%s1572_s4 + $0x210] sm:$0xff]  ;;  %v1160_v5 = vstv %s1068_s21  ;;  %s1465_s18 = sld [smem:[#allocation2 + $0x6]] }
  0x15   :  { %557 = vmatpush.msra.mxu0 %v792_v28  ;;  %580 = vmatpush.msra.mxu1 %v818_v29  ;;  %v810_v45 = vld [vmem:[%s1572_s4 + $0x2e0] sm:$0xff]  ;;  %v785_v46 = vld [vmem:[%s1572_s4 + $0x218] sm:$0xff]  ;;  %v811_v47 = vld [vmem:[%s1572_s4 + $0x2e8] sm:$0xff]  ;;  %v1173_v9 = vstv %s1076_s29  ;;  %s1473_s21 = sld [smem:[#allocation2 + $0x7]] }
  0x16   :  { %597 = vmatpush.msra.mxu2 %v793_v30  ;;  %620 = vmatpush.msra.mxu3 %v819_v31  ;;  %v782_v48 = vld [vmem:[%s1572_s4 + $0x200] sm:$0xff]  ;;  %v808_v49 = vld [vmem:[%s1572_s4 + $0x2d0] sm:$0xff]  ;;  %v783_v51 = vld [vmem:[%s1572_s4 + $0x208] sm:$0xff]  ;;  %v1182_v12 = vstv %s1084_s11  ;;  %s749_s11 = sshll.u32 %s885_s25, 4  ;;  %s750_s11 = int_to_ptr.vmem [resolvable:$true] %s749_s11 }
  0x17   :  { %558 = vmatpush.msra.mxu0 %v790_v32  ;;  %581 = vmatpush.msra.mxu1 %v816_v33  ;;  %v259_v50 = vld [vmem:[%s1572_s4 + $0xf0] sm:$0xff]  ;;  %v809_v55 = vld [vmem:[%s1572_s4 + $0x2d8] sm:$0xff]  ;;  %v257_v58 = vld [vmem:[%s1572_s4 + $0xe0] sm:$0xff]  ;;  %v1185_v13 = vstv %s1092_s19 }
  0x18   :  { %598 = vmatpush.msra.mxu2 %v791_v34  ;;  %621 = vmatpush.msra.mxu3 %v817_v35  ;;  %v780_v54 = vld [vmem:[%s1572_s4 + $0x1f0] sm:$0xff]  ;;  %v285_v59 = vld [vmem:[%s1572_s4 + $0x1c0] sm:$0x1]  ;;  %v781_v63 = vld [vmem:[%s1572_s4 + $0x1f8] sm:$0xff]  ;;  %v1203_v17 = vstv %s1100_s26 }
  0x19   :  { %559 = vmatpush.msra.mxu0 %v788_v36  ;;  %582 = vmatpush.msra.mxu1 %v814_v37  ;;  %v778_v62 = vld [vmem:[%s1572_s4 + $0x1e0] sm:$0xff]  ;;  %v255_v2 = vld [vmem:[%s1572_s4 + $0xd0] sm:$0xff]  ;;  %v779_v6 = vld [vmem:[%s1572_s4 + $0x1e8] sm:$0xff] }
  0x1a   :  { %599 = vmatpush.msra.mxu2 %v789_v38  ;;  %622 = vmatpush.msra.mxu3 %v815_v39  ;;  %v283_v3 = vld [vmem:[%s1572_s4 + $0x1b0] sm:$0xff]  ;;  %v253_v7 = vld [vmem:[%s1572_s4 + $0xc0] sm:$0xff]  ;;  %v260_v10 = vld [vmem:[%s1572_s4 + $0xf8] sm:$0xff] }
  0x1b   :  { %560 = vmatpush.msra.mxu0 %v786_v40  ;;  %583 = vmatpush.msra.mxu1 %v812_v41  ;;  %v776_v4 = vld [vmem:[%s1572_s4 + $0x1d0] sm:$0xff]  ;;  %v281_v8 = vld [vmem:[%s1572_s4 + $0x1a0] sm:$0xff]  ;;  %v777_v11 = vld [vmem:[%s1572_s4 + $0x1d8] sm:$0xff] }
  0x1c   :  { %600 = vmatpush.msra.mxu2 %v787_v42  ;;  %623 = vmatpush.msra.mxu3 %v813_v43  ;;  %v1190_v14 = vld [vmem:[%s1568_s0 + $0x8] sm:$0xff]  ;;  %v1195_v15 = vld [vmem:[%s1568_s0 + $0x18] sm:$0xff]  ;;  %v1200_v16 = vld [vmem:[%s1570_s2] sm:$0xf] }
  0x1d   :  { %561 = vmatpush.msra.mxu0 %v784_v44  ;;  %584 = vmatpush.msra.mxu1 %v810_v45  ;;  %v251_v18 = vld [vmem:[%s1572_s4 + $0xb0] sm:$0xff]  ;;  %v1214_v20 = vld [vmem:[%s1571_s3] sm:$0xf]  ;;  %v290_v21 = vmul.f32 %v1109_v52, %v1190_v14  ;;  %v292_v22 = vmul.f32 %v1109_v52, %v1195_v15  ;;  %v296_v23 = vmul.f32 %v1112_v53, %v1190_v14  ;;  %v448_v24 = vperm.slane %v1200_v16, 3  ;;  %v258_v25 = vld [vmem:[%s1572_s4 + $0xe8] sm:$0xff] }
  0x1e   :  { %601 = vmatpush.msra.mxu2 %v785_v46  ;;  %624 = vmatpush.msra.mxu3 %v811_v47  ;;  %v279_v19 = vld [vmem:[%s1572_s4 + $0x190] sm:$0xff]  ;;  %v286_v26 = vld [vmem:[%s1572_s4 + $0x1c8] sm:$0x1]  ;;  %v298_v27 = vmul.f32 %v1112_v53, %v1195_v15  ;;  %v318_v28 = vmul.f32 %v1121_v56, %v1190_v14  ;;  %v320_v29 = vmul.f32 %v1121_v56, %v1195_v15  ;;  %v458_v30 = vperm.slane %v1214_v20, 3  ;;  %v249_v31 = vld [vmem:[%s1572_s4 + $0xa0] sm:$0xff] }
  0x1f   :  { %562 = vmatpush.msra.mxu0 %v782_v48  ;;  %585 = vmatpush.msra.mxu1 %v808_v49  ;;  %v277_v32 = vld [vmem:[%s1572_s4 + $0x180] sm:$0xff]  ;;  %v304_v33 = vrot.slane %v296_v23, 1  ;;  %v340_v34 = vmul.f32 %v1124_v57, %v1190_v14  ;;  %v342_v35 = vmul.f32 %v1124_v57, %v1195_v15  ;;  %v1248_v36 = vmul.f32 %v1133_v60, %v1190_v14  ;;  %v256_v37 = vld [vmem:[%s1572_s4 + $0xd8] sm:$0xff]  ;;  %v247_v43 = vld [vmem:[%s1572_s4 + $0x90] sm:$0xff] }
  0x20   :  { %602 = vmatpush.msra.mxu2 %v783_v51  ;;  %625 = vmatpush.msra.mxu3 %v809_v55  ;;  %v284_v38 = vld [vmem:[%s1572_s4 + $0x1b8] sm:$0xff]  ;;  %v306_v39 = vrot.slane %v298_v27, 1  ;;  %v326_v40 = vrot.slane %v318_v28, 2  ;;  %v328_v41 = vrot.slane %v320_v29, 2  ;;  %v1258_v42 = vmul.f32 %v1133_v60, %v1195_v15  ;;  %v275_v44 = vld [vmem:[%s1572_s4 + $0x170] sm:$0xff]  ;;  %v254_v49 = vld [vmem:[%s1572_s4 + $0xc8] sm:$0xff] }
  0x21   :  { %647 = vmatpush.msrb.mxu1 %v259_v50  ;;  %563 = vmatpush.msra.mxu0 %v780_v54  ;;  %v312_v45 = vadd.f32 %v304_v33, %v290_v21  ;;  %v348_v46 = vrot.slane %v340_v34, 3  ;;  %v350_v47 = vrot.slane %v342_v35, 3  ;;  %v370_v48 = vrot.slane %v1248_v36, 4  ;;  %v282_v50 = vld [vmem:[%s1572_s4 + $0x1a8] sm:$0xff]  ;;  %v243_v21 = vld [vmem:[%s1572_s4 + $0x70] sm:$0xff]  ;;  %v241_v35 = vld [vmem:[%s1572_s4 + $0x60] sm:$0xff] }
  0x22   :  { %838 = vmatpush.msk.msrb.mxu3 %vm543_vm0, %v285_v59  ;;  %603 = vmatpush.msra.mxu2 %v781_v63  ;;  %v314_v51 = vadd.f32 %v306_v39, %v292_v22  ;;  %v372_v54 = vrot.slane %v1258_v42, 4  ;;  %v384_v55 = vmul.f32 %v1136_v61, %v1190_v14  ;;  %v245_v59 = vld [vmem:[%s1572_s4 + $0x80] sm:$0xff]  ;;  %v271_v22 = vld [vmem:[%s1572_s4 + $0x150] sm:$0xff]  ;;  %v250_v28 = vld [vmem:[%s1572_s4 + $0xa8] sm:$0xff]  ;;  %v1336_v33 = vperm.slane %v458_v30, 1 }
  0x23   :  { %648 = vmatpush.msrb.mxu1 %v257_v58  ;;  %564 = vmatpush.msra.mxu0 %v778_v62  ;;  %v386_v58 = vmul.f32 %v1136_v61, %v1195_v15  ;;  %v273_v62 = vld [vmem:[%s1572_s4 + $0x160] sm:$0xff]  ;;  %v334_v63 = vadd.f32 %v326_v40, %v312_v45  ;;  %v1325_v27 = vld [vmem:[%s1568_s0 + $0x10] sm:$0xff]  ;;  %v278_v29 = vld [vmem:[%s1572_s4 + $0x188] sm:$0xff] }
  0x24   :  { %671 = vmatpush.msrb.mxu3 %v283_v3  ;;  %604 = vmatpush.msra.mxu2 %v779_v6  ;;  %v1291_v3 = vmul.f32 %v1145_v0, %v1195_v15  ;;  %v252_v6 = vld [vmem:[%s1572_s4 + $0xb8] sm:$0xff]  ;;  %v269_v36 = vld [vmem:[%s1572_s4 + $0x140] sm:$0xff]  ;;  %v291_v30 = vmul.f32 %v1109_v52, %v1325_v27  ;;  %vm742_vm5 = vmor %vm741_vm4, %vm738_vm3 }
  0x25   :  { %649 = vmatpush.msrb.mxu1 %v255_v2  ;;  %565 = vmatpush.msra.mxu0 %v776_v4  ;;  %v1287_v2 = vmul.f32 %v1145_v0, %v1190_v14  ;;  %v1293_v4 = vperm.slane %v448_v24, 1  ;;  %v356_v23 = vadd.f32 %v348_v46, %v334_v63  ;;  %v248_v40 = vld [vmem:[%s1572_s4 + $0x98] sm:$0xff]  ;;  %v239_v46 = vld [vmem:[%s1572_s4 + $0x50] sm:$0xff]  ;;  %v265_v63 = vld [vmem:[%s1572_s4 + $0x120] sm:$0xff] }
  0x26   :  { %672 = vmatpush.msrb.mxu3 %v281_v8  ;;  %605 = vmatpush.msra.mxu2 %v777_v11  ;;  %v336_v8 = vadd.f32 %v328_v41, %v314_v51  ;;  %v394_v11 = vrot.slane %v386_v58, 5  ;;  %v276_v41 = vld [vmem:[%s1572_s4 + $0x178] sm:$0xff]  ;;  %v246_v51 = vld [vmem:[%s1572_s4 + $0x88] sm:$0xff] }
  0x27   :  { %650 = vmatpush.msrb.mxu1 %v253_v7  ;;  %687 = vmatpush.msrb.mxu0 %v260_v10  ;;  %v280_v7 = vld [vmem:[%s1572_s4 + $0x198] sm:$0xff]  ;;  %v392_v10 = vrot.slane %v384_v55, 5  ;;  %v414_v24 = vrot.slane %v1287_v2, 6 }
  0x28   :  { %673 = vmatpush.msrb.mxu3 %v279_v19  ;;  %840 = vmatpush.msk.msrb.mxu2 %vm543_vm0, %v286_v26  ;;  %v1308_v19 = vld [vmem:[%s1568_s0] sm:$0xff]  ;;  %v1320_v26 = vmul.f32 %v1148_v1, %v1195_v15 }
  0x29   :  { %651 = vmatpush.msrb.mxu1 %v251_v18  ;;  %688 = vmatpush.msrb.mxu0 %v258_v25  ;;  %v1303_v18 = vmul.f32 %v1148_v1, %v1190_v14  ;;  %v416_v25 = vrot.slane %v1291_v3, 6  ;;  %v289_v34 = vmul.f32 %v1109_v52, %v1308_v19  ;;  %v295_v39 = vmul.f32 %v1112_v53, %v1308_v19 }
  0x2a   :  { %674 = vmatpush.msrb.mxu3 %v277_v32  ;;  %711 = vmatpush.msrb.mxu2 %v284_v38  ;;  %v438_v38 = vrot.slane %v1320_v26, 7  ;;  %v317_v52 = vmul.f32 %v1121_v56, %v1308_v19 }
  0x2b   :  { %652 = vmatpush.msrb.mxu1 %v249_v31  ;;  %689 = vmatpush.msrb.mxu0 %v256_v37  ;;  %v358_v31 = vadd.f32 %v350_v47, %v336_v8  ;;  %v436_v32 = vrot.slane %v1303_v18, 7  ;;  %v378_v37 = vadd.f32 %v370_v48, %v356_v23  ;;  %v267_v47 = vld [vmem:[%s1572_s4 + $0x130] sm:$0xff]  ;;  %v303_v48 = vrot.slane %v295_v39, 1  ;;  %v272_v8 = vld [vmem:[%s1572_s4 + $0x158] sm:$0xff]  ;;  %v261_v39 = vld [vmem:[%s1572_s4 + $0x100] sm:$0xff] }
  0x2c   :  { %675 = vmatpush.msrb.mxu3 %v275_v44  ;;  %712 = vmatpush.msrb.mxu2 %v282_v50  ;;  %v447_v44 = vperm.slane %v1200_v16, 1  ;;  %v325_v58 = vrot.slane %v317_v52, 2  ;;  %v361_v18 = vmul.f32 %v1133_v60, %v1308_v19  ;;  %v263_v23 = vld [vmem:[%s1572_s4 + $0x110] sm:$0xff]  ;;  %v268_v52 = vld [vmem:[%s1572_s4 + $0x138] sm:$0xff] }
  0x2d   :  { %653 = vmatpush.msrb.mxu1 %v247_v43  ;;  %690 = vmatpush.msrb.mxu0 %v254_v49  ;;  %v380_v42 = vadd.f32 %v372_v54, %v358_v31  ;;  %v297_v43 = vmul.f32 %v1112_v53, %v1325_v27  ;;  %v400_v45 = vadd.f32 %v392_v10, %v378_v37  ;;  %v274_v54 = vld [vmem:[%s1572_s4 + $0x168] sm:$0xff] }
  0x2e   :  { %676 = vmatpush.msrb.mxu3 %v273_v62  ;;  %713 = vmatpush.msrb.mxu2 %v280_v7  ;;  %v319_v53 = vmul.f32 %v1121_v56, %v1325_v27  ;;  %v339_v49 = vmul.f32 %v1124_v57, %v1308_v19  ;;  %v237_v62 = vld [vmem:[%s1572_s4 + $0x40] sm:$0xff]  ;;  %v311_v2 = vadd.f32 %v303_v48, %v289_v34  ;;  %v1402_v26 = vperm.slane %v447_v44, 1  ;;  %v270_v31 = vld [vmem:[%s1572_s4 + $0x148] sm:$0xff] }
  0x2f   :  { %654 = vmatpush.msrb.mxu1 %v245_v59  ;;  %691 = vmatpush.msrb.mxu0 %v252_v6  ;;  %v402_v50 = vadd.f32 %v394_v11, %v380_v42  ;;  %v305_v55 = vrot.slane %v297_v43, 1  ;;  %v341_v59 = vmul.f32 %v1124_v57, %v1325_v27  ;;  %v422_v56 = vadd.f32 %v414_v24, %v400_v45  ;;  %v244_v57 = vld [vmem:[%s1572_s4 + $0x78] sm:$0xff] }
  0x30   :  { %677 = vmatpush.msrb.mxu3 %v271_v22  ;;  %714 = vmatpush.msrb.mxu2 %v278_v29  ;;  %v327_v3 = vrot.slane %v319_v53, 2  ;;  %v347_v6 = vrot.slane %v339_v49, 3  ;;  %v235_v22 = vld [vmem:[%s1572_s4 + $0x30] sm:$0xff]  ;;  %v333_v24 = vadd.f32 %v325_v58, %v311_v2  ;;  %v242_v29 = vld [vmem:[%s1572_s4 + $0x68] sm:$0xff]  ;;  %v369_v34 = vrot.slane %v361_v18, 4 }
  0x31   :  { %655 = vmatpush.msrb.mxu1 %v243_v21  ;;  %692 = vmatpush.msrb.mxu0 %v250_v28  ;;  %v424_v7 = vadd.f32 %v416_v25, %v402_v50  ;;  %v313_v10 = vadd.f32 %v305_v55, %v291_v30  ;;  %v349_v11 = vrot.slane %v341_v59, 3  ;;  %v444_v21 = vadd.f32 %v436_v32, %v422_v56  ;;  %v233_v30 = vld [vmem:[%s1572_s4 + $0x20] sm:$0xff]  ;;  %v231_v50 = vld [vmem:[%s1572_s4 + $0x10] sm:$0xff] }
  0x32   :  { %678 = vmatpush.msrb.mxu3 %v269_v36  ;;  %715 = vmatpush.msrb.mxu2 %v276_v41  ;;  %v363_v25 = vmul.f32 %v1133_v60, %v1325_v27  ;;  %v355_v36 = vadd.f32 %v347_v6, %v333_v24  ;;  %v405_v43 = vmul.f32 %v1145_v0, %v1308_v19  ;;  %v229_v59 = vld [vmem:[%s1572_s4] sm:$0xff]  ;;  %v457_v2 = vperm.slane %v1214_v20, 1 }
  0x33   :  { %656 = vmatpush.msrb.mxu1 %v241_v35  ;;  %693 = vmatpush.msrb.mxu0 %v248_v40  ;;  %v446_v28 = vadd.f32 %v438_v38, %v424_v7  ;;  %v335_v32 = vadd.f32 %v327_v3, %v313_v10  ;;  %v383_v35 = vmul.f32 %v1136_v61, %v1308_v19  ;;  %v236_v3 = vld [vmem:[%s1572_s4 + $0x38] sm:$0xff] }
  0x34   :  { %679 = vmatpush.msrb.mxu3 %v267_v47  ;;  %716 = vmatpush.msrb.mxu2 %v274_v54  ;;  %v454_v60 = vmul.f32 %v1293_v4, %v444_v21  ;;  %v371_v37 = vrot.slane %v363_v25, 4  ;;  %v385_v38 = vmul.f32 %v1136_v61, %v1325_v27  ;;  %v240_v61 = vld [vmem:[%s1572_s4 + $0x58] sm:$0xff]  ;;  %v413_v53 = vrot.slane %v405_v43, 6 }
  0x35   :  { %657 = vmatpush.msrb.mxu1 %v239_v46  ;;  %694 = vmatpush.msrb.mxu0 %v246_v51  ;;  %v456_v40 = vmul.f32 %v1293_v4, %v446_v28  ;;  %v357_v41 = vadd.f32 %v349_v11, %v335_v32  ;;  %v391_v42 = vrot.slane %v383_v35, 5  ;;  %v377_v4 = vadd.f32 %v369_v34, %v355_v36  ;;  %v238_v51 = vld [vmem:[%s1572_s4 + $0x48] sm:$0xff] }
  0x36   :  { %680 = vmatpush.msrb.mxu3 %v265_v63  ;;  %717 = vmatpush.msrb.mxu2 %v272_v8  ;;  %v464_v44 = vadd.f32 %v1336_v33, %v454_v60  ;;  %v393_v45 = vrot.slane %v385_v38, 5  ;;  %v407_v46 = vmul.f32 %v1145_v0, %v1325_v27  ;;  %v427_v49 = vmul.f32 %v1148_v1, %v1308_v19  ;;  %v266_v0 = vld [vmem:[%s1572_s4 + $0x128] sm:$0xff]  ;;  %v264_v8 = vld [vmem:[%s1572_s4 + $0x118] sm:$0xff] }
  0x37   :  { %658 = vmatpush.msrb.mxu1 %v237_v62  ;;  %695 = vmatpush.msrb.mxu0 %v244_v57  ;;  %v466_v47 = vadd.f32 %v1336_v33, %v456_v40  ;;  %v379_v48 = vadd.f32 %v371_v37, %v357_v41  ;;  %v399_v54 = vadd.f32 %v391_v42, %v377_v4  ;;  %v461_v18 = vperm.slane %v457_v2, 1 }
  0x38   :  { %681 = vmatpush.msrb.mxu3 %v263_v23  ;;  %718 = vmatpush.msrb.mxu2 %v270_v31  ;;  %v468_v33 = vmax.f32 %v464_v44, 0.0  ;;  %v415_v55 = vrot.slane %v407_v46, 6  ;;  %v429_v58 = vmul.f32 %v1148_v1, %v1325_v27  ;;  %v435_v63 = vrot.slane %v427_v49, 7 }
  0x39   :  { %659 = vmatpush.msrb.mxu1 %v235_v22  ;;  %696 = vmatpush.msrb.mxu0 %v242_v29  ;;  %v470_v56 = vmax.f32 %v466_v47, 0.0  ;;  %v401_v62 = vadd.f32 %v393_v45, %v379_v48  ;;  %v421_v6 = vadd.f32 %v413_v53, %v399_v54  ;;  %v46_v7 = vmul.f32 %v1160_v5, %v1190_v14 }
  0x3a   :  { %682 = vmatpush.msrb.mxu3 %v261_v39  ;;  %719 = vmatpush.msrb.mxu2 %v268_v52  ;;  %v437_v1 = vrot.slane %v429_v58, 7  ;;  %v48_v57 = vmul.f32 %v1160_v5, %v1195_v15  ;;  %v52_v21 = vmul.f32 %v1173_v9, %v1190_v14  ;;  %v54_v23 = vmul.f32 %v1173_v9, %v1195_v15 }
  0x3b   :  { %660 = vmatpush.msrb.mxu1 %v233_v30  ;;  %697 = vmatpush.msrb.mxu0 %v240_v61  ;;  %v537_v10 = vrot.slane %v470_v56, 7  ;;  %v423_v11 = vadd.f32 %v415_v55, %v401_v62  ;;  %v443_v22 = vadd.f32 %v435_v63, %v421_v6  ;;  %v74_v24 = vmul.f32 %v1182_v12, %v1190_v14  ;;  %v234_v62 = vld [vmem:[%s1572_s4 + $0x28] sm:$0xff] }
  0x3c   :  { %720 = vmatpush.msrb.mxu2 %v266_v0  ;;  %v76_v25 = vmul.f32 %v1182_v12, %v1195_v15  ;;  %v60_v31 = vrot.slane %v52_v21, 1  ;;  %v96_v32 = vmul.f32 %v1185_v13, %v1190_v14  ;;  %v62_v35 = vrot.slane %v54_v23, 1  ;;  %v262_v63 = vld [vmem:[%s1572_s4 + $0x108] sm:$0xff] }
  0x3d   :  { %661 = vmatpush.msrb.mxu1 %v231_v50  ;;  %698 = vmatpush.msrb.mxu0 %v238_v51  ;;  %v538_v28 = vsel %vm535_vm1, %v537_v10, %v468_v33  ;;  %v445_v29 = vadd.f32 %v437_v1, %v423_v11  ;;  %v453_v34 = vmul.f32 %v1402_v26, %v443_v22  ;;  %v82_v60 = vrot.slane %v74_v24, 2 }
  0x3e   :  { %721 = vmatpush.msrb.mxu2 %v264_v8  ;;  %837 = vmatmul.msk.f32.vlgmr.msra.gmra.mxu3 %vm540_vm2, %v538_v28  ;;  %v84_v36 = vrot.slane %v76_v25, 2  ;;  %v68_v38 = vadd.f32 %v60_v31, %v46_v7  ;;  %v98_v30 = vmul.f32 %v1185_v13, %v1195_v15  ;;  %v104_v39 = vrot.slane %v96_v32, 3  ;;  %v232_v7 = vld [vmem:[%s1572_s4 + $0x18] sm:$0xff] }
  0x3f   :  { %662 = vmatpush.msrb.mxu1 %v229_v59  ;;  %699 = vmatpush.msrb.mxu0 %v236_v3  ;;  %v455_v37 = vmul.f32 %v1402_v26, %v445_v29  ;;  %v463_v40 = vadd.f32 %v461_v18, %v453_v34  ;;  %v70_v41 = vadd.f32 %v62_v35, %v48_v57  ;;  %v1489_v4 = vstv %s1451_s9 }
  0x40   :  { %835 = vmatmul.msk.f32.vlgmr.msra.gmra.mxu1 %vm540_vm2, %v538_v28  ;;  %v118_v42 = vmul.f32 %v1203_v17, %v1190_v14  ;;  %v120_v43 = vmul.f32 %v1203_v17, %v1195_v15  ;;  %v90_v52 = vadd.f32 %v82_v60, %v68_v38  ;;  %v106_v44 = vrot.slane %v98_v30, 3  ;;  %722 = vmatpush.msrb.mxu2 %v262_v63 }
  0x41   :  { %v465_v61 = vadd.f32 %v461_v18, %v455_v37  ;;  %v467_v26 = vmax.f32 %v463_v40, 0.0  ;;  %v92_v45 = vadd.f32 %v84_v36, %v70_v41  ;;  %v140_v49 = vmul.f32 %v1489_v4, %v1190_v14  ;;  %700 = vmatpush.msrb.mxu0 %v234_v62 }
  0x42   :  { %v126_v46 = vrot.slane %v118_v42, 4  ;;  %v128_v47 = vrot.slane %v120_v43, 4  ;;  %v112_v53 = vadd.f32 %v104_v39, %v90_v52  ;;  %v142_v50 = vmul.f32 %v1489_v4, %v1195_v15 }
  0x43   :  { %v469_v48 = vmax.f32 %v465_v61, 0.0  ;;  %v114_v51 = vadd.f32 %v106_v44, %v92_v45  ;;  %v1496_v0 = vstv %s1465_s18  ;;  %v1499_v33 = vstv %s1473_s21  ;;  %701 = vmatpush.msrb.mxu0 %v232_v7 }
  0x44   :  { %v205_v54 = vperm.slane %v1200_v16, 2  ;;  %v134_v58 = vadd.f32 %v126_v46, %v112_v53  ;;  %v148_v59 = vrot.slane %v140_v49, 5  ;;  %v150_v56 = vrot.slane %v142_v50, 5 }
  0x45   :  { %v534_v55 = vrot.slane %v469_v48, 7  ;;  %v136_v2 = vadd.f32 %v128_v47, %v114_v51  ;;  %v162_v3 = vmul.f32 %v1496_v0, %v1190_v14  ;;  %v164_v6 = vmul.f32 %v1496_v0, %v1195_v15 }
  0x46   :  { %v184_v1 = vmul.f32 %v1499_v33, %v1190_v14  ;;  %v156_v8 = vadd.f32 %v148_v59, %v134_v58  ;;  %v186_v10 = vmul.f32 %v1499_v33, %v1195_v15  ;;  %v209_v11 = vperm.slane %v205_v54, 0  ;;  %v230_v14 = vld [vmem:[%s1572_s4 + $0x8] sm:$0xff] }
  0x47   :  { %v536_v57 = vsel %vm535_vm1, %v534_v55, %v467_v26  ;;  %v158_v18 = vadd.f32 %v150_v56, %v136_v2  ;;  %v170_v21 = vrot.slane %v162_v3, 6  ;;  %v172_v22 = vrot.slane %v164_v6, 6  ;;  %702 = vmatpush.msrb.mxu0 %v230_v14 }
  0x48   :  { %606 = vmatmul.f32.vlgmr.msra.gmra.mxu2 %v536_v57  ;;  %v192_v23 = vrot.slane %v184_v1, 7  ;;  %566 = vmatmul.f32.vlgmr.msra.gmra.mxu0 %v536_v57  ;;  %v194_v24 = vrot.slane %v186_v10, 7  ;;  %v216_v25 = vperm.slane %v1214_v20, 2  ;;  %v45_v28 = vmul.f32 %v1160_v5, %v1308_v19 }
  0x49   :  { %v47_v15 = vmul.f32 %v1160_v5, %v1325_v27  ;;  %v178_v29 = vadd.f32 %v170_v21, %v156_v8  ;;  %v180_v31 = vadd.f32 %v172_v22, %v158_v18  ;;  %v51_v32 = vmul.f32 %v1173_v9, %v1308_v19 }
  0x4a   :  { %v53_v34 = vmul.f32 %v1173_v9, %v1325_v27  ;;  %v220_v35 = vperm.slane %v216_v25, 0  ;;  %v73_v60 = vmul.f32 %v1182_v12, %v1308_v19  ;;  %v75_v36 = vmul.f32 %v1182_v12, %v1325_v27 }
  0x4b   :  { %v95_v37 = vmul.f32 %v1185_v13, %v1308_v19  ;;  %v200_v5 = vadd.f32 %v192_v23, %v178_v29  ;;  %v202_v38 = vadd.f32 %v194_v24, %v180_v31  ;;  %v59_v30 = vrot.slane %v51_v32, 1 }
  0x4c   :  { %v61_v39 = vrot.slane %v53_v34, 1  ;;  %v81_v40 = vrot.slane %v73_v60, 2  ;;  %v83_v41 = vrot.slane %v75_v36, 2  ;;  %v97_v9 = vmul.f32 %v1185_v13, %v1325_v27 }
  0x4d   :  { %v103_v42 = vrot.slane %v95_v37, 3  ;;  %v211_v43 = vmul.f32 %v209_v11, %v200_v5  ;;  %v213_v61 = vmul.f32 %v209_v11, %v202_v38  ;;  %v67_v52 = vadd.f32 %v59_v30, %v45_v28 }
  0x4e   :  { %v69_v44 = vadd.f32 %v61_v39, %v47_v15  ;;  %v105_v26 = vrot.slane %v97_v9, 3  ;;  %v117_v12 = vmul.f32 %v1203_v17, %v1308_v19  ;;  %v119_v45 = vmul.f32 %v1203_v17, %v1325_v27 }
  0x4f   :  { %v139_v46 = vmul.f32 %v1489_v4, %v1308_v19  ;;  %v222_v47 = vadd.f32 %v220_v35, %v211_v43  ;;  %v224_v48 = vadd.f32 %v220_v35, %v213_v61  ;;  %v89_v53 = vadd.f32 %v81_v40, %v67_v52  ;;  %v727_v40 = vld [vmem:[%s1573_s5] sm:$0x3] }
  0x50   :  { %v91_v49 = vadd.f32 %v83_v41, %v69_v44  ;;  %v125_v13 = vrot.slane %v117_v12, 4  ;;  %v127_v50 = vrot.slane %v119_v45, 4  ;;  %v141_v51 = vmul.f32 %v1489_v4, %v1325_v27 }
  0x51   :  { %v147_v54 = vrot.slane %v139_v46, 5  ;;  %v226_v55 = vmax.f32 %v222_v47, 0.0  ;;  %v228_v58 = vmax.f32 %v224_v48, 0.0  ;;  %v111_v59 = vadd.f32 %v103_v42, %v89_v53 }
  0x52   :  { %v113_v56 = vadd.f32 %v105_v26, %v91_v49  ;;  %v149_v62 = vrot.slane %v141_v51, 5  ;;  %v161_v17 = vmul.f32 %v1496_v0, %v1308_v19  ;;  %v163_v63 = vmul.f32 %v1496_v0, %v1325_v27 }
  0x53   :  { %v183_v2 = vmul.f32 %v1499_v33, %v1308_v19  ;;  %v636_v3 = vrot.slane %v228_v58, 7  ;;  %v133_v6 = vadd.f32 %v125_v13, %v111_v59  ;;  %v185_v4 = vmul.f32 %v1499_v33, %v1325_v27 }
  0x54   :  { %v135_v1 = vadd.f32 %v127_v50, %v113_v56  ;;  %v169_v7 = vrot.slane %v161_v17, 6  ;;  %v171_v57 = vrot.slane %v163_v63, 6  ;;  %v204_v10 = vperm.slane %v1200_v16, 0 }
  0x55   :  { %v191_v8 = vrot.slane %v183_v2, 7  ;;  %v637_v11 = vsel %vm535_vm1, %v636_v3, %v226_v55  ;;  %v155_v18 = vadd.f32 %v147_v54, %v133_v6  ;;  %v193_v22 = vrot.slane %v185_v4, 7 }
  0x56   :  { %v157_v21 = vadd.f32 %v149_v62, %v135_v1  ;;  %839 = vmatmul.msk.f32.vlgmr.msrb.gmra.mxu3 %vm540_vm2, %v637_v11  ;;  %v215_v19 = vperm.slane %v1214_v20, 0  ;;  %841 = vmatmul.msk.f32.vlgmr.msrb.gmra.mxu2 %vm540_vm2, %v637_v11  ;;  %v208_v14 = vperm.slane %v204_v10, 0  ;;  %v730_v43 = vperm.slane %v727_v40, 1 }
  0x57   :  { %v177_v0 = vadd.f32 %v169_v7, %v155_v18  ;;  %v729_v52 = vperm.slane %v727_v40, 0 }
  0x58   :  { %v179_v23 = vadd.f32 %v171_v57, %v157_v21  ;;  %v219_v24 = vperm.slane %v215_v19, 0 }
  0x59   :  { %v199_v27 = vadd.f32 %v191_v8, %v177_v0 }
  0x5a   :  { %v201_v33 = vadd.f32 %v193_v22, %v179_v23 }
  0x5b   :  { %v210_v25 = vmul.f32 %v208_v14, %v199_v27 }
  0x5c   :  { %v212_v28 = vmul.f32 %v208_v14, %v201_v33 }
  0x5d   :  { %v221_v16 = vadd.f32 %v219_v24, %v210_v25 }
  0x5e   :  { %v223_v15 = vadd.f32 %v219_v24, %v212_v28 }
  0x5f   :  { %v225_v29 = vmax.f32 %v221_v16, 0.0 }
  0x60   :  { %v227_v31 = vmax.f32 %v223_v15, 0.0 }
  0x62   :  { %v634_v32 = vrot.slane %v227_v31, 7 }
  0x64   :  { %v635_v34 = vsel %vm535_vm1, %v634_v32, %v225_v29 }
  0x65   :  { %663 = vmatmul.f32.vlgmr.msrb.gmra.mxu1 %v635_v34  ;;  %703 = vmatmul.f32.vlgmr.msrb.gmra.mxu0 %v635_v34 }
  0xbd   :  { %v587_v60 = vpop.f32.mrf.mxu1 }
  0xc1   :  { %v627_v20 = vpop.f32.mrf.mxu3 }
  0xc5   :  { %v567_v36 = vpop.f32.mrf.mxu0 }
  0xc6   :  { %v588_v37 = vadd.f32 %v587_v60, %v567_v36 }
  0xcb   :  { %v607_v35 = vpop.f32.mrf.mxu2 }
  0xcc   :  { %v628_v5 = vadd.f32 %v627_v20, %v607_v35 }
  0xd9   :  { %v684_v38 = vpop.f32.mrf.mxu3  ;;  %v724_v30 = vpop.f32.mrf.mxu2 }
  0xe2   :  { %v664_v39 = vpop.f32.mrf.mxu1  ;;  %v704_v41 = vpop.f32.mrf.mxu0 }
  0xe3   :  { %v665_v9 = vadd.f32 %v664_v39, %v588_v37  ;;  %v705_v42 = vadd.f32 %v704_v41, %v628_v5 }
  0xe5   :  { %v685_v61 = vadd.f32 %v684_v38, %v665_v9  ;;  %v725_v44 = vadd.f32 %v724_v30, %v705_v42 }
  0xe7   :  { %v734_v26 = vadd.f32 %v730_v43, %v725_v44  ;;  %v733_v12 = vadd.f32 %v729_v52, %v685_v61 }
  0xe9   :  { %v737_v45 = vrot.slane %v734_v26, 6 }
  0xeb   :  { %v739_v46 = vsel %vm738_vm3, %v733_v12, %v737_v45 }
  0xec   :  { %743 = vst.msk [vmem:[#allocation5] sm:$0xf] %vm742_vm5, %v739_v46 }
  0xed   :  { %754 = dma.vmem_to_hbm [thread:$0]  %s750_s11, 64, %s752_s28, [#allocation3]  }
  0xee   :  { %882 = dma.done.wait [#allocation3], 64  }
  0xef   :  { %883 = vsyncadd [#allocation3], 4294967232 }
  0xf0   :  { %759 = vsyncpa [#allocation3], 1 }
  0xf1   :  { %760 = vsyncpa [#allocation4], 1 }

</bundles_post_ra>
